<compile_context>
chip_gen: v5e
topology: v5e:2x2
jax: 0.10.0
libtpu: 0.0.40
codegen_flags: <defaults>
</compile_context>

<pallas_src>
from functools import partial

import jax
import jax.numpy as jnp
from jax.experimental import pallas as pl
from jax.experimental.pallas import tpu as pltpu


def _total_energy_kernel(x_ref, cond_ref, w1_ref, w2_ref, b2_ref, w3_ref, out_ref, *,
                         n_levels):
    """One tile of base images -> per-(level, image) energy factors (without b3)."""
    x = x_ref[...]                                                          # (tile_b, D) bf16
    # The expensive D-wide matmul runs once per base image (not once per (image, level)).
    h1_base = jnp.dot(x, w1_ref[...], preferred_element_type=jnp.float32)   # (tile_b, H1) f32

    w2 = w2_ref[...]                                                        # (H1, H1) bf16
    b2 = b2_ref[...]                                                        # (1, H1)  f32
    w3 = w3_ref[...]                                                        # (1, H1)  f32

    # Statically unrolled level loop: no (tile_b, L, H1) broadcast, no reshape relayout.
    for lvl in range(n_levels):
        cond_l = cond_ref[pl.ds(lvl, 1), :]                                 # (1, H1) f32
        h1 = jnp.maximum(h1_base + cond_l, 0.0)                             # (tile_b, H1) f32
        h2 = jnp.dot(h1.astype(jnp.bfloat16), w2,
                     preferred_element_type=jnp.float32) + b2
        h2 = jnp.maximum(h2, 0.0)                                           # (tile_b, H1) f32
        # Width-1 "matmul" on the VPU/XLU (keeps the MXU free; avoids f32 MXU passes on v5e).
        out_ref[lvl, :] = jnp.sum(h2 * w3, axis=-1)                         # (tile_b,) f32


def _pick_tile(batch, feature_dim, vmem_budget=24 << 20):
    """Rows per tile: whole batch if it fits, else a 256-aligned tile sized from the budget."""
    bytes_per_row = 2 * feature_dim                       # bf16 x row
    cap = (vmem_budget // 2) // (2 * bytes_per_row)       # 2x: double-buffered x stream
    cap = max(128, min(512, cap))                         # multi-tile outputs need lane-dense 128
    if batch <= cap:
        return batch                                      # single tile; block == full array dims
    if cap >= 256:
        return (cap // 256) * 256                         # MXU M-fill on v6e/v7x
    return 128


def _vmem_limit_bytes(tile_b, feature_dim, hidden, n_levels):
    """Derive the scoped-VMEM limit from actual buffer sizes (stay under v7x's 64 MiB)."""
    x_b = 2 * tile_b * feature_dim * 2                    # bf16 x tile, double-buffered
    w1_b = 2 * feature_dim * hidden * 2
    w2_b = 2 * hidden * hidden * 2
    small = 2 * (n_levels * hidden + 2 * hidden) * 4      # cond / b2 / w3
    out_b = 2 * n_levels * tile_b * 4
    inter = 3 * tile_b * hidden * 4                       # live f32 intermediates
    total = x_b + w1_b + w2_b + small + out_b + inter
    total = int(total * 1.5) + (4 << 20)                  # headroom
    return max(16 << 20, min(total, 48 << 20))


@jax.jit
def total_energy(data, levels, params):
    """data: (B, C, H, W) NCHW.  levels: (L, 1).  Returns (B, 1) f32."""
    B = data.shape[0]
    L = levels.shape[0]
    D = data.shape[1] * data.shape[2] * data.shape[3]
    w1, wl, b1, w2, b2, w3, b3 = params
    H1 = w1.shape[1]

    # Flatten base images only (no L x repeat_interleave materialization); fold the level
    # conditioning and b1 into a small (L, H1) f32 table; matmul operands to bf16.
    x = data.reshape(B, D).astype(jnp.bfloat16)
    cond = jnp.dot(levels.astype(jnp.float32), wl,
                   preferred_element_type=jnp.float32) + b1                 # (L, H1) f32
    w1_b = w1.astype(jnp.bfloat16)
    w2_b = w2.astype(jnp.bfloat16)
    w3_row = w3.reshape(1, H1).astype(jnp.float32)

    tile_b = _pick_tile(B, D)
    b_pad = pl.cdiv(B, tile_b) * tile_b
    if b_pad != B:
        # Ragged batch: zero-pad; padded columns are dropped in the epilogue.
        x = jnp.pad(x, ((0, b_pad - B), (0, 0)))
    num_tiles = b_pad // tile_b

    x_spec = pl.BlockSpec((tile_b, D), lambda t: (t, 0))
    if num_tiles >= 3:
        # Deeper buffering on the dominant HBM stream once there is enough work to pipeline.
        x_spec = pl.BlockSpec((tile_b, D), lambda t: (t, 0), pipeline_mode=pl.Buffered(3))

    factors_lb = pl.pallas_call(
        partial(_total_energy_kernel, n_levels=L),
        out_shape=jax.ShapeDtypeStruct((L, b_pad), jnp.float32),
        grid_spec=pltpu.PrefetchScalarGridSpec(
            num_scalar_prefetch=0,
            grid=(num_tiles,),
            in_specs=[
                x_spec,
                pl.BlockSpec((L, H1), lambda t: (0, 0)),
                pl.BlockSpec((D, H1), lambda t: (0, 0)),
                pl.BlockSpec((H1, H1), lambda t: (0, 0)),
                pl.BlockSpec((1, H1), lambda t: (0, 0)),
                pl.BlockSpec((1, H1), lambda t: (0, 0)),
            ],
            out_specs=pl.BlockSpec((L, tile_b), lambda t: (0, t)),
        ),
        compiler_params=pltpu.CompilerParams(
            dimension_semantics=("parallel",),
            vmem_limit_bytes=_vmem_limit_bytes(tile_b, D, H1, L),
        ),
    )(x, cond, w1_b, w2_b, b2, w3_row)

    # Epilogue on B*L scalars (plain XLA, negligible): torch row n = (image n//L, level n%L);
    # factors.view(-1, B, 1).sum(0) bins rows by n % B; each bin sums L factors -> + L * b3.
    factors_torch = jnp.transpose(factors_lb[:, :B]).reshape(B * L)         # torch row order
    result = factors_torch.reshape(L, B).sum(axis=0)[:, None] + L * b3      # (B, 1)
    return result


def init_energy_params(key, feature_dim, hidden=128):
    k1, k2, k3, k4, k5, k6, k7 = jax.random.split(key, 7)
    w1 = 0.02 * jax.random.normal(k1, (feature_dim, hidden), jnp.float32)
    wl = 0.02 * jax.random.normal(k2, (1, hidden), jnp.float32)
    b1 = 0.01 * jax.random.normal(k3, (1, hidden), jnp.float32)
    w2 = 0.02 * jax.random.normal(k4, (hidden, hidden), jnp.float32)
    b2 = 0.01 * jax.random.normal(k5, (1, hidden), jnp.float32)
    w3 = 0.02 * jax.random.normal(k6, (hidden, 1), jnp.float32)
    b3 = 0.01 * jax.random.normal(k7, (1, 1), jnp.float32)
    return (w1, wl, b1, w2, b2, w3, b3)


# -------------- pure-JAX reference (torch ordering, same bf16 matmul policy) --------------
def total_energy_reference(data, levels, params):
    w1, wl, b1, w2, b2, w3, b3 = params
    B = data.shape[0]
    L = levels.shape[0]
    x = jnp.repeat(data.reshape(B, -1), L, axis=0)           # repeat_interleave(L, dim=0)
    lv = jnp.tile(levels, (B, 1))                             # torch.cat(B * [levels])
    h1 = jnp.dot(x.astype(jnp.bfloat16), w1.astype(jnp.bfloat16),
                 preferred_element_type=jnp.float32)
    h1 = jnp.maximum(h1 + lv * wl + b1, 0.0)
    h2 = jnp.dot(h1.astype(jnp.bfloat16), w2.astype(jnp.bfloat16),
                 preferred_element_type=jnp.float32)
    h2 = jnp.maximum(h2 + b2, 0.0)
    f = jnp.dot(h2, w3, preferred_element_type=jnp.float32) + b3
    return f.reshape(-1, B, 1).sum(axis=0)


if __name__ == "__main__":
    key = jax.random.PRNGKey(0)
    k_data, k_params = jax.random.split(key)

    B, C, H, W = 2, 4, 16, 16
    L = 4
    data = jax.random.normal(k_data, (B, C, H, W), jnp.float32)
    levels = jnp.linspace(0.1, 1.0, L, dtype=jnp.float32).reshape(L, 1)
    params = init_energy_params(k_params, C * H * W, hidden=128)

    out = total_energy(data, levels, params)
    out = jax.block_until_ready(out)
    assert out.shape == (B, 1)

    ref = total_energy_reference(data, levels, params)
    assert jnp.allclose(out, ref, atol=1e-3, rtol=1e-3), (out, ref)

    print("KERNEL_OK")
</pallas_src>

<mosaic_0001>
module attributes {stable_mosaic.version = 11 : i64} {
  func.func @_total_energy_kernel(%arg0: i32, %arg1: memref<2x1024xbf16, #tpu.memory_space<vmem>>, %arg2: memref<4x128xf32, #tpu.memory_space<vmem>>, %arg3: memref<1024x128xbf16, #tpu.memory_space<vmem>>, %arg4: memref<128x128xbf16, #tpu.memory_space<vmem>>, %arg5: memref<1x128xf32, #tpu.memory_space<vmem>>, %arg6: memref<1x128xf32, #tpu.memory_space<vmem>>, %arg7: memref<4x2xf32, #tpu.memory_space<vmem>>) attributes {dimension_semantics = [#tpu.dimension_semantics<parallel>], iteration_bounds = array<i64: 1>, scalar_prefetch = 0 : i64, scratch_operands = 0 : i64, tpu.core_type = #tpu.core_type<tc>, window_params = [{transform_indices = @transform_0, window_bounds = array<i64: 2, 1024>}, {pipeline_mode = #tpu.pipeline_mode<synchronous>, transform_indices = @transform_1, window_bounds = array<i64: 4, 128>}, {pipeline_mode = #tpu.pipeline_mode<synchronous>, transform_indices = @transform_2, window_bounds = array<i64: 1024, 128>}, {pipeline_mode = #tpu.pipeline_mode<synchronous>, transform_indices = @transform_3, window_bounds = array<i64: 128, 128>}, {pipeline_mode = #tpu.pipeline_mode<synchronous>, transform_indices = @transform_4, window_bounds = array<i64: 1, 128>}, {pipeline_mode = #tpu.pipeline_mode<synchronous>, transform_indices = @transform_5, window_bounds = array<i64: 1, 128>}, {transform_indices = @transform_6, window_bounds = array<i64: 4, 2>}]} {
    %c0 = arith.constant 0 : index
    %c0_0 = arith.constant 0 : index
    %0 = vector.load %arg1[%c0, %c0_0] : memref<2x1024xbf16, #tpu.memory_space<vmem>>, vector<2x1024xbf16>
    %c0_1 = arith.constant 0 : index
    %c0_2 = arith.constant 0 : index
    %1 = vector.load %arg3[%c0_1, %c0_2] : memref<1024x128xbf16, #tpu.memory_space<vmem>>, vector<1024x128xbf16>
    %cst = arith.constant dense<0.000000e+00> : vector<2x128xf32>
    %2 = tpu.matmul %0, %1, %cst {dimension_numbers = #tpu.dot_dimension_numbers<[1], [0], [0], [1], [0, 0, 1, 1], [], []>} : vector<2x1024xbf16>, vector<1024x128xbf16>, vector<2x128xf32> -> vector<2x128xf32>
    %c0_3 = arith.constant 0 : index
    %c0_4 = arith.constant 0 : index
    %3 = vector.load %arg4[%c0_3, %c0_4] : memref<128x128xbf16, #tpu.memory_space<vmem>>, vector<128x128xbf16>
    %c0_5 = arith.constant 0 : index
    %c0_6 = arith.constant 0 : index
    %4 = vector.load %arg5[%c0_5, %c0_6] : memref<1x128xf32, #tpu.memory_space<vmem>>, vector<1x128xf32>
    %c0_7 = arith.constant 0 : index
    %c0_8 = arith.constant 0 : index
    %5 = vector.load %arg6[%c0_7, %c0_8] : memref<1x128xf32, #tpu.memory_space<vmem>>, vector<1x128xf32>
    %c0_9 = arith.constant 0 : index
    %c0_10 = arith.constant 0 : index
    %6 = vector.load %arg2[%c0_9, %c0_10] : memref<4x128xf32, #tpu.memory_space<vmem>>, vector<1x128xf32>
    %7 = vector.broadcast %6 : vector<1x128xf32> to vector<2x128xf32>
    %8 = arith.addf %2, %7 : vector<2x128xf32>
    %cst_11 = arith.constant 0.000000e+00 : f32
    %9 = vector.broadcast %cst_11 : f32 to vector<2x128xf32>
    %10 = arith.maximumf %8, %9 : vector<2x128xf32>
    %11 = arith.truncf %10 : vector<2x128xf32> to vector<2x128xbf16>
    %cst_12 = arith.constant dense<0.000000e+00> : vector<2x128xf32>
    %12 = tpu.matmul %11, %3, %cst_12 {dimension_numbers = #tpu.dot_dimension_numbers<[1], [0], [0], [1], [0, 0, 1, 1], [], []>} : vector<2x128xbf16>, vector<128x128xbf16>, vector<2x128xf32> -> vector<2x128xf32>
    %13 = vector.broadcast %4 : vector<1x128xf32> to vector<2x128xf32>
    %14 = arith.addf %12, %13 : vector<2x128xf32>
    %cst_13 = arith.constant 0.000000e+00 : f32
    %15 = vector.broadcast %cst_13 : f32 to vector<2x128xf32>
    %16 = arith.maximumf %14, %15 : vector<2x128xf32>
    %17 = vector.broadcast %5 : vector<1x128xf32> to vector<2x128xf32>
    %18 = arith.mulf %16, %17 : vector<2x128xf32>
    %cst_14 = arith.constant dense<0.000000e+00> : vector<2xf32>
    %19 = vector.multi_reduction <add>, %18, %cst_14 [1] : vector<2x128xf32> to vector<2xf32>
    %c0_15 = arith.constant 0 : index
    %c0_16 = arith.constant 0 : index
    %20 = vector.load %arg7[%c0_15, %c0_16] : memref<4x2xf32, #tpu.memory_space<vmem>>, vector<1x2xf32>
    %21 = vector.shape_cast %20 : vector<1x2xf32> to vector<2xf32>
    %22 = vector.shape_cast %19 : vector<2xf32> to vector<1x2xf32>
    tpu.vector_store %arg7[%c0_15, %c0_16], %22 {strides = array<i32>} : memref<4x2xf32, #tpu.memory_space<vmem>>, vector<1x2xf32>,
    %c1 = arith.constant 1 : index
    %c0_17 = arith.constant 0 : index
    %23 = vector.load %arg2[%c1, %c0_17] : memref<4x128xf32, #tpu.memory_space<vmem>>, vector<1x128xf32>
    %24 = vector.broadcast %23 : vector<1x128xf32> to vector<2x128xf32>
    %25 = arith.addf %2, %24 : vector<2x128xf32>
    %cst_18 = arith.constant 0.000000e+00 : f32
    %26 = vector.broadcast %cst_18 : f32 to vector<2x128xf32>
    %27 = arith.maximumf %25, %26 : vector<2x128xf32>
    %28 = arith.truncf %27 : vector<2x128xf32> to vector<2x128xbf16>
    %cst_19 = arith.constant dense<0.000000e+00> : vector<2x128xf32>
    %29 = tpu.matmul %28, %3, %cst_19 {dimension_numbers = #tpu.dot_dimension_numbers<[1], [0], [0], [1], [0, 0, 1, 1], [], []>} : vector<2x128xbf16>, vector<128x128xbf16>, vector<2x128xf32> -> vector<2x128xf32>
    %30 = vector.broadcast %4 : vector<1x128xf32> to vector<2x128xf32>
    %31 = arith.addf %29, %30 : vector<2x128xf32>
    %cst_20 = arith.constant 0.000000e+00 : f32
    %32 = vector.broadcast %cst_20 : f32 to vector<2x128xf32>
    %33 = arith.maximumf %31, %32 : vector<2x128xf32>
    %34 = vector.broadcast %5 : vector<1x128xf32> to vector<2x128xf32>
    %35 = arith.mulf %33, %34 : vector<2x128xf32>
    %cst_21 = arith.constant dense<0.000000e+00> : vector<2xf32>
    %36 = vector.multi_reduction <add>, %35, %cst_21 [1] : vector<2x128xf32> to vector<2xf32>
    %c1_22 = arith.constant 1 : index
    %c0_23 = arith.constant 0 : index
    %37 = vector.load %arg7[%c1_22, %c0_23] : memref<4x2xf32, #tpu.memory_space<vmem>>, vector<1x2xf32>
    %38 = vector.shape_cast %37 : vector<1x2xf32> to vector<2xf32>
    %39 = vector.shape_cast %36 : vector<2xf32> to vector<1x2xf32>
    tpu.vector_store %arg7[%c1_22, %c0_23], %39 {strides = array<i32>} : memref<4x2xf32, #tpu.memory_space<vmem>>, vector<1x2xf32>,
    %c2 = arith.constant 2 : index
    %c0_24 = arith.constant 0 : index
    %40 = vector.load %arg2[%c2, %c0_24] : memref<4x128xf32, #tpu.memory_space<vmem>>, vector<1x128xf32>
    %41 = vector.broadcast %40 : vector<1x128xf32> to vector<2x128xf32>
    %42 = arith.addf %2, %41 : vector<2x128xf32>
    %cst_25 = arith.constant 0.000000e+00 : f32
    %43 = vector.broadcast %cst_25 : f32 to vector<2x128xf32>
    %44 = arith.maximumf %42, %43 : vector<2x128xf32>
    %45 = arith.truncf %44 : vector<2x128xf32> to vector<2x128xbf16>
    %cst_26 = arith.constant dense<0.000000e+00> : vector<2x128xf32>
    %46 = tpu.matmul %45, %3, %cst_26 {dimension_numbers = #tpu.dot_dimension_numbers<[1], [0], [0], [1], [0, 0, 1, 1], [], []>} : vector<2x128xbf16>, vector<128x128xbf16>, vector<2x128xf32> -> vector<2x128xf32>
    %47 = vector.broadcast %4 : vector<1x128xf32> to vector<2x128xf32>
    %48 = arith.addf %46, %47 : vector<2x128xf32>
    %cst_27 = arith.constant 0.000000e+00 : f32
    %49 = vector.broadcast %cst_27 : f32 to vector<2x128xf32>
    %50 = arith.maximumf %48, %49 : vector<2x128xf32>
    %51 = vector.broadcast %5 : vector<1x128xf32> to vector<2x128xf32>
    %52 = arith.mulf %50, %51 : vector<2x128xf32>
    %cst_28 = arith.constant dense<0.000000e+00> : vector<2xf32>
    %53 = vector.multi_reduction <add>, %52, %cst_28 [1] : vector<2x128xf32> to vector<2xf32>
    %c2_29 = arith.constant 2 : index
    %c0_30 = arith.constant 0 : index
    %54 = vector.load %arg7[%c2_29, %c0_30] : memref<4x2xf32, #tpu.memory_space<vmem>>, vector<1x2xf32>
    %55 = vector.shape_cast %54 : vector<1x2xf32> to vector<2xf32>
    %56 = vector.shape_cast %53 : vector<2xf32> to vector<1x2xf32>
    tpu.vector_store %arg7[%c2_29, %c0_30], %56 {strides = array<i32>} : memref<4x2xf32, #tpu.memory_space<vmem>>, vector<1x2xf32>,
    %c3 = arith.constant 3 : index
    %c0_31 = arith.constant 0 : index
    %57 = vector.load %arg2[%c3, %c0_31] : memref<4x128xf32, #tpu.memory_space<vmem>>, vector<1x128xf32>
    %58 = vector.broadcast %57 : vector<1x128xf32> to vector<2x128xf32>
    %59 = arith.addf %2, %58 : vector<2x128xf32>
    %cst_32 = arith.constant 0.000000e+00 : f32
    %60 = vector.broadcast %cst_32 : f32 to vector<2x128xf32>
    %61 = arith.maximumf %59, %60 : vector<2x128xf32>
    %62 = arith.truncf %61 : vector<2x128xf32> to vector<2x128xbf16>
    %cst_33 = arith.constant dense<0.000000e+00> : vector<2x128xf32>
    %63 = tpu.matmul %62, %3, %cst_33 {dimension_numbers = #tpu.dot_dimension_numbers<[1], [0], [0], [1], [0, 0, 1, 1], [], []>} : vector<2x128xbf16>, vector<128x128xbf16>, vector<2x128xf32> -> vector<2x128xf32>
    %64 = vector.broadcast %4 : vector<1x128xf32> to vector<2x128xf32>
    %65 = arith.addf %63, %64 : vector<2x128xf32>
    %cst_34 = arith.constant 0.000000e+00 : f32
    %66 = vector.broadcast %cst_34 : f32 to vector<2x128xf32>
    %67 = arith.maximumf %65, %66 : vector<2x128xf32>
    %68 = vector.broadcast %5 : vector<1x128xf32> to vector<2x128xf32>
    %69 = arith.mulf %67, %68 : vector<2x128xf32>
    %cst_35 = arith.constant dense<0.000000e+00> : vector<2xf32>
    %70 = vector.multi_reduction <add>, %69, %cst_35 [1] : vector<2x128xf32> to vector<2xf32>
    %c3_36 = arith.constant 3 : index
    %c0_37 = arith.constant 0 : index
    %71 = vector.load %arg7[%c3_36, %c0_37] : memref<4x2xf32, #tpu.memory_space<vmem>>, vector<1x2xf32>
    %72 = vector.shape_cast %71 : vector<1x2xf32> to vector<2xf32>
    %73 = vector.shape_cast %70 : vector<2xf32> to vector<1x2xf32>
    tpu.vector_store %arg7[%c3_36, %c0_37], %73 {strides = array<i32>} : memref<4x2xf32, #tpu.memory_space<vmem>>, vector<1x2xf32>,
    return
  }
  func.func @transform_0(%arg0: i32) -> (i32, i32) {
    %c0_i32 = arith.constant 0 : i32
    %c0_i32_0 = arith.constant 0 : i32
    return %arg0, %c0_i32 : i32, i32
  }
  func.func @transform_1(%arg0: i32) -> (i32, i32) {
    %c0_i32 = arith.constant 0 : i32
    %c0_i32_0 = arith.constant 0 : i32
    %c0_i32_1 = arith.constant 0 : i32
    return %c0_i32, %c0_i32_0 : i32, i32
  }
  func.func @transform_2(%arg0: i32) -> (i32, i32) {
    %c0_i32 = arith.constant 0 : i32
    %c0_i32_0 = arith.constant 0 : i32
    %c0_i32_1 = arith.constant 0 : i32
    return %c0_i32, %c0_i32_0 : i32, i32
  }
  func.func @transform_3(%arg0: i32) -> (i32, i32) {
    %c0_i32 = arith.constant 0 : i32
    %c0_i32_0 = arith.constant 0 : i32
    %c0_i32_1 = arith.constant 0 : i32
    return %c0_i32, %c0_i32_0 : i32, i32
  }
  func.func @transform_4(%arg0: i32) -> (i32, i32) {
    %c0_i32 = arith.constant 0 : i32
    %c0_i32_0 = arith.constant 0 : i32
    %c0_i32_1 = arith.constant 0 : i32
    return %c0_i32, %c0_i32_0 : i32, i32
  }
  func.func @transform_5(%arg0: i32) -> (i32, i32) {
    %c0_i32 = arith.constant 0 : i32
    %c0_i32_0 = arith.constant 0 : i32
    %c0_i32_1 = arith.constant 0 : i32
    return %c0_i32, %c0_i32_0 : i32, i32
  }
  func.func @transform_6(%arg0: i32) -> (i32, i32) {
    %c0_i32 = arith.constant 0 : i32
    %c0_i32_0 = arith.constant 0 : i32
    return %c0_i32, %arg0 : i32, i32
  }
}

</mosaic_0001>

<bundles_post_ra>
// kernel: total_energy.1
= control target key start
LH: loop header
LB: loop body
LE: loop exit
PB: predicated region body
PF: predicated region fallthrough
CT: control target
= control target key end

     0   :  { %vm750_vm0 = vcmask 1041408   ;;  %vm759_vm1 = vcmask 8192   ;;  %s1500_s2 = inlined_call_operand.vmem [shape: bf16[1024,128], index: 2, kind: input, shape index: {}]   ;;  %s1501_s0 = inlined_call_operand.vmem [shape: bf16[2,1024], index: 0, kind: input, shape index: {}]   ;;  %s1502_s1 = inlined_call_operand.vmem [shape: f32[4,128], index: 1, kind: input, shape index: {}]   ;;  %s1503_s4 = inlined_call_operand.vmem [shape: f32[1,128], index: 4, kind: input, shape index: {}]   ;;  %s1504_s3 = inlined_call_operand.vmem [shape: bf16[128,128], index: 3, kind: input, shape index: {}]   ;;  %s1505_s5 = inlined_call_operand.vmem [shape: f32[1,128], index: 5, kind: input, shape index: {}]   ;;  %s1506_s6 = inlined_call_operand.vmem [shape: f32[4,2], index: 6, kind: output, shape index: {}]  }
   0x1   :  { %v1141_v0 = vld [vmem:[%s1500_s2 + $0x38] sm:$0xff]  ;;  %v1140_v4 = vld [vmem:[%s1500_s2 + $0x30] sm:$0xff]  ;;  %v1139_v8 = vld [vmem:[%s1500_s2 + $0x28] sm:$0xff] }
   0x2   :  { %v1149_v1 = vld [vmem:[%s1500_s2 + $0x78] sm:$0xff]  ;;  %554 = vmatpush.bf16.msra.mxu0 %v1141_v0  ;;  %v1148_v5 = vld [vmem:[%s1500_s2 + $0x70] sm:$0xff]  ;;  %v1147_v9 = vld [vmem:[%s1500_s2 + $0x68] sm:$0xff] }
   0x3   :  { %v1157_v2 = vld [vmem:[%s1500_s2 + $0xb8] sm:$0xff]  ;;  %567 = vmatpush.bf16.msra.mxu1 %v1149_v1  ;;  %v1156_v6 = vld [vmem:[%s1500_s2 + $0xb0] sm:$0xff]  ;;  %v1155_v10 = vld [vmem:[%s1500_s2 + $0xa8] sm:$0xff] }
   0x4   :  { %v1165_v3 = vld [vmem:[%s1500_s2 + $0xf8] sm:$0xff]  ;;  %580 = vmatpush.bf16.msra.mxu2 %v1157_v2  ;;  %v1164_v7 = vld [vmem:[%s1500_s2 + $0xf0] sm:$0xff]  ;;  %v1163_v11 = vld [vmem:[%s1500_s2 + $0xe8] sm:$0xff] }
   0x5   :  { %593 = vmatpush.bf16.msra.mxu3 %v1165_v3  ;;  %v1138_v12 = vld [vmem:[%s1500_s2 + $0x20] sm:$0xff]  ;;  %v1137_v17 = vld [vmem:[%s1500_s2 + $0x18] sm:$0xff]  ;;  %v1136_v21 = vld [vmem:[%s1500_s2 + $0x10] sm:$0xff] }
   0x6   :  { %555 = vmatpush.bf16.msra.mxu0 %v1140_v4  ;;  %v1146_v13 = vld [vmem:[%s1500_s2 + $0x60] sm:$0xff]  ;;  %v1145_v18 = vld [vmem:[%s1500_s2 + $0x58] sm:$0xff]  ;;  %v1144_v22 = vld [vmem:[%s1500_s2 + $0x50] sm:$0xff] }
   0x7   :  { %568 = vmatpush.bf16.msra.mxu1 %v1148_v5  ;;  %v1154_v14 = vld [vmem:[%s1500_s2 + $0xa0] sm:$0xff]  ;;  %v1153_v19 = vld [vmem:[%s1500_s2 + $0x98] sm:$0xff]  ;;  %v1152_v23 = vld [vmem:[%s1500_s2 + $0x90] sm:$0xff] }
   0x8   :  { %581 = vmatpush.bf16.msra.mxu2 %v1156_v6  ;;  %v1162_v15 = vld [vmem:[%s1500_s2 + $0xe0] sm:$0xff]  ;;  %v1161_v20 = vld [vmem:[%s1500_s2 + $0xd8] sm:$0xff]  ;;  %v1160_v24 = vld [vmem:[%s1500_s2 + $0xd0] sm:$0xff] }
   0x9   :  { %594 = vmatpush.bf16.msra.mxu3 %v1164_v7  ;;  %v23_v16 = vld [vmem:[%s1501_s0] sm:$0xff]  ;;  %v1135_v25 = vld [vmem:[%s1500_s2 + $0x8] sm:$0xff]  ;;  %v1173_v33 = vld [vmem:[%s1500_s2 + $0x138] sm:$0xff] }
   0xa   :  { %556 = vmatpush.bf16.msra.mxu0 %v1139_v8  ;;  %153 = vst [vmem:[#allocation1] ss:$9 sm:$0xff] %v23_v16  ;;  %v1143_v26 = vld [vmem:[%s1500_s2 + $0x48] sm:$0xff]  ;;  %v1134_v29 = vld [vmem:[%s1500_s2] sm:$0xff]  ;;  %v1181_v34 = vld [vmem:[%s1500_s2 + $0x178] sm:$0xff] }
   0xb   :  { %569 = vmatpush.bf16.msra.mxu1 %v1147_v9  ;;  %v1151_v27 = vld [vmem:[%s1500_s2 + $0x88] sm:$0xff]  ;;  %v1142_v30 = vld [vmem:[%s1500_s2 + $0x40] sm:$0xff]  ;;  %v1189_v35 = vld [vmem:[%s1500_s2 + $0x1b8] sm:$0xff] }
   0xc   :  { %582 = vmatpush.bf16.msra.mxu2 %v1155_v10  ;;  %v1159_v28 = vld [vmem:[%s1500_s2 + $0xc8] sm:$0xff]  ;;  %v1150_v31 = vld [vmem:[%s1500_s2 + $0x80] sm:$0xff]  ;;  %v1197_v36 = vld [vmem:[%s1500_s2 + $0x1f8] sm:$0xff] }
   0xd   :  { %595 = vmatpush.bf16.msra.mxu3 %v1163_v11  ;;  %v1158_v32 = vld [vmem:[%s1500_s2 + $0xc0] sm:$0xff]  ;;  %v1172_v37 = vld [vmem:[%s1500_s2 + $0x130] sm:$0xff]  ;;  %v1171_v45 = vld [vmem:[%s1500_s2 + $0x128] sm:$0xff] }
   0xe   :  { %557 = vmatpush.bf16.msra.mxu0 %v1138_v12  ;;  %v1180_v40 = vld [vmem:[%s1500_s2 + $0x170] sm:$0xff]  ;;  %v1179_v46 = vld [vmem:[%s1500_s2 + $0x168] sm:$0xff]  ;;  %v1170_v49 = vld [vmem:[%s1500_s2 + $0x120] sm:$0xff] }
   0xf   :  { %570 = vmatpush.bf16.msra.mxu1 %v1146_v13  ;;  %v1188_v43 = vld [vmem:[%s1500_s2 + $0x1b0] sm:$0xff]  ;;  %v1187_v47 = vld [vmem:[%s1500_s2 + $0x1a8] sm:$0xff]  ;;  %v1178_v50 = vld [vmem:[%s1500_s2 + $0x160] sm:$0xff] }
  0x10   :  { %583 = vmatpush.bf16.msra.mxu2 %v1154_v14  ;;  %v1196_v44 = vld [vmem:[%s1500_s2 + $0x1f0] sm:$0xff]  ;;  %v1195_v48 = vld [vmem:[%s1500_s2 + $0x1e8] sm:$0xff]  ;;  %v1186_v51 = vld [vmem:[%s1500_s2 + $0x1a0] sm:$0xff] }
  0x11   :  { %596 = vmatpush.bf16.msra.mxu3 %v1162_v15  ;;  %v156_v38 = vld [vmem:[#allocation1 + $0x12] sm:$0xff]  ;;  %v154_v39 = vld [vmem:[#allocation1] sm:$0xff]  ;;  %v155_v42 = vld [vmem:[#allocation1 + $0x9] sm:$0xff] }
  0x12   :  { %558 = vmatpush.bf16.msra.mxu0 %v1137_v17  ;;  %v157_v41 = vld [vmem:[#allocation1 + $0x1b] sm:$0xff]  ;;  %v1168_v57 = vld [vmem:[%s1500_s2 + $0x110] sm:$0xff]  ;;  %v1167_v61 = vld [vmem:[%s1500_s2 + $0x108] sm:$0xff] }
  0x13   :  { %571 = vmatpush.bf16.msra.mxu1 %v1145_v18  ;;  %v1194_v52 = vld [vmem:[%s1500_s2 + $0x1e0] sm:$0xff]  ;;  %v1169_v53 = vld [vmem:[%s1500_s2 + $0x118] sm:$0xff]  ;;  %v1176_v58 = vld [vmem:[%s1500_s2 + $0x150] sm:$0xff] }
  0x14   :  { %584 = vmatpush.bf16.msra.mxu2 %v1153_v19  ;;  %v1177_v54 = vld [vmem:[%s1500_s2 + $0x158] sm:$0xff]  ;;  %v1184_v59 = vld [vmem:[%s1500_s2 + $0x190] sm:$0xff]  ;;  %v1175_v62 = vld [vmem:[%s1500_s2 + $0x148] sm:$0xff] }
  0x15   :  { %597 = vmatpush.bf16.msra.mxu3 %v1161_v20  ;;  %v1185_v55 = vld [vmem:[%s1500_s2 + $0x198] sm:$0xff]  ;;  %v1192_v60 = vld [vmem:[%s1500_s2 + $0x1d0] sm:$0xff]  ;;  %v1183_v63 = vld [vmem:[%s1500_s2 + $0x188] sm:$0xff] }
  0x16   :  { %559 = vmatpush.bf16.msra.mxu0 %v1136_v21  ;;  %v1193_v56 = vld [vmem:[%s1500_s2 + $0x1d8] sm:$0xff]  ;;  %v1191_v0 = vld [vmem:[%s1500_s2 + $0x1c8] sm:$0xff]  ;;  %v1166_v1 = vld [vmem:[%s1500_s2 + $0x100] sm:$0xff] }
  0x17   :  { %572 = vmatpush.bf16.msra.mxu1 %v1144_v22  ;;  %v1174_v2 = vld [vmem:[%s1500_s2 + $0x140] sm:$0xff]  ;;  %v159_v6 = vld [vmem:[#allocation1 + $0x2d] sm:$0xff]  ;;  %v160_v7 = vld [vmem:[#allocation1 + $0x36] sm:$0xff] }
  0x18   :  { %585 = vmatpush.bf16.msra.mxu2 %v1152_v23  ;;  %v1182_v3 = vld [vmem:[%s1500_s2 + $0x180] sm:$0xff]  ;;  %v1205_v9 = vld [vmem:[%s1504_s3 + $0x38] sm:$0xff]  ;;  %v1204_v10 = vld [vmem:[%s1504_s3 + $0x30] sm:$0xff] }
  0x19   :  { %598 = vmatpush.bf16.msra.mxu3 %v1160_v24  ;;  %v1190_v4 = vld [vmem:[%s1500_s2 + $0x1c0] sm:$0xff]  ;;  %v1203_v11 = vld [vmem:[%s1504_s3 + $0x28] sm:$0xff]  ;;  %v1201_v13 = vld [vmem:[%s1504_s3 + $0x18] sm:$0xff] }
  0x1a   :  { %560 = vmatpush.bf16.msra.mxu0 %v1135_v25  ;;  %v158_v5 = vld [vmem:[#allocation1 + $0x24] sm:$0xff]  ;;  %v1200_v16 = vld [vmem:[%s1504_s3 + $0x10] sm:$0xff] }
  0x1b   :  { %573 = vmatpush.bf16.msra.mxu1 %v1143_v26  ;;  %v161_v8 = vld [vmem:[#allocation1 + $0x3f] sm:$0xff]  ;;  %v1199_v18 = vld [vmem:[%s1504_s3 + $0x8] sm:$0xff] }
  0x1c   :  { %586 = vmatpush.bf16.msra.mxu2 %v1151_v27  ;;  %v1202_v12 = vld [vmem:[%s1504_s3 + $0x20] sm:$0xff] }
  0x1d   :  { %599 = vmatpush.bf16.msra.mxu3 %v1159_v28  ;;  %v1198_v22 = vld [vmem:[%s1504_s3] sm:$0xff] }
  0x1e   :  { %561 = vmatpush.bf16.msra.mxu0 %v1134_v29 }
  0x1f   :  { %574 = vmatpush.bf16.msra.mxu1 %v1142_v30 }
  0x20   :  { %587 = vmatpush.bf16.msra.mxu2 %v1150_v31 }
  0x21   :  { %600 = vmatpush.bf16.msra.mxu3 %v1158_v32  ;;  %562 = vmatmul.bf16.vlgmr.msra.gmra.mxu0 %v154_v39  ;;  %v1208_v39 = vld [vmem:[%s1502_s1 + $0x2] ss:$0 sm:$0xff] }
  0x22   :  { %606 = vmatpush.bf16.msrb.mxu0 %v1173_v33  ;;  %575 = vmatmul.bf16.vlgmr.msra.gmra.mxu1 %v155_v42 }
  0x23   :  { %619 = vmatpush.bf16.msrb.mxu1 %v1181_v34  ;;  %588 = vmatmul.bf16.vlgmr.msra.gmra.mxu2 %v156_v38  ;;  %v1206_v34 = vld [vmem:[%s1502_s1] ss:$0 sm:$0xff]  ;;  %v1207_v38 = vld [vmem:[%s1502_s1 + $0x1] ss:$0 sm:$0xff] }
  0x24   :  { %632 = vmatpush.bf16.msrb.mxu2 %v1189_v35  ;;  %601 = vmatmul.bf16.vlgmr.msra.gmra.mxu3 %v157_v41 }
  0x25   :  { %645 = vmatpush.bf16.msrb.mxu3 %v1197_v36 }
  0x26   :  { %607 = vmatpush.bf16.msrb.mxu0 %v1172_v37 }
  0x27   :  { %620 = vmatpush.bf16.msrb.mxu1 %v1180_v40  ;;  %v1209_v40 = vld [vmem:[%s1502_s1 + $0x3] ss:$0 sm:$0xff] }
  0x28   :  { %633 = vmatpush.bf16.msrb.mxu2 %v1188_v43 }
  0x29   :  { %646 = vmatpush.bf16.msrb.mxu3 %v1196_v44 }
  0x2a   :  { %608 = vmatpush.bf16.msrb.mxu0 %v1171_v45 }
  0x2b   :  { %621 = vmatpush.bf16.msrb.mxu1 %v1179_v46 }
  0x2c   :  { %634 = vmatpush.bf16.msrb.mxu2 %v1187_v47 }
  0x2d   :  { %647 = vmatpush.bf16.msrb.mxu3 %v1195_v48 }
  0x2e   :  { %609 = vmatpush.bf16.msrb.mxu0 %v1170_v49 }
  0x2f   :  { %622 = vmatpush.bf16.msrb.mxu1 %v1178_v50 }
  0x30   :  { %635 = vmatpush.bf16.msrb.mxu2 %v1186_v51 }
  0x31   :  { %648 = vmatpush.bf16.msrb.mxu3 %v1194_v52 }
  0x32   :  { %610 = vmatpush.bf16.msrb.mxu0 %v1169_v53 }
  0x33   :  { %623 = vmatpush.bf16.msrb.mxu1 %v1177_v54 }
  0x34   :  { %636 = vmatpush.bf16.msrb.mxu2 %v1185_v55 }
  0x35   :  { %649 = vmatpush.bf16.msrb.mxu3 %v1193_v56  ;;  %v1210_v56 = vld [vmem:[%s1503_s4] ss:$0 sm:$0xff] }
  0x36   :  { %611 = vmatpush.bf16.msrb.mxu0 %v1168_v57 }
  0x37   :  { %624 = vmatpush.bf16.msrb.mxu1 %v1176_v58 }
  0x38   :  { %637 = vmatpush.bf16.msrb.mxu2 %v1184_v59 }
  0x39   :  { %650 = vmatpush.bf16.msrb.mxu3 %v1192_v60  ;;  %v1211_v60 = vld [vmem:[%s1505_s5] ss:$0 sm:$0xff] }
  0x3a   :  { %612 = vmatpush.bf16.msrb.mxu0 %v1167_v61 }
  0x3b   :  { %625 = vmatpush.bf16.msrb.mxu1 %v1175_v62 }
  0x3c   :  { %638 = vmatpush.bf16.msrb.mxu2 %v1183_v63 }
  0x3d   :  { %651 = vmatpush.bf16.msrb.mxu3 %v1191_v0 }
  0x3e   :  { %613 = vmatpush.bf16.msrb.mxu0 %v1166_v1 }
  0x3f   :  { %626 = vmatpush.bf16.msrb.mxu1 %v1174_v2 }
  0x40   :  { %639 = vmatpush.bf16.msrb.mxu2 %v1182_v3 }
  0x41   :  { %652 = vmatpush.bf16.msrb.mxu3 %v1190_v4  ;;  %614 = vmatmul.bf16.vlgmr.msrb.gmra.mxu0 %v158_v5 }
  0x42   :  { %627 = vmatmul.bf16.vlgmr.msrb.gmra.mxu1 %v159_v6  ;;  %732 = vmatpush.bf16.msra.mxu0 %v1205_v9 }
  0x43   :  { %640 = vmatmul.bf16.vlgmr.msrb.gmra.mxu2 %v160_v7  ;;  %766 = vmatpush.bf16.msra.mxu1 %v1205_v9 }
  0x44   :  { %653 = vmatmul.bf16.vlgmr.msrb.gmra.mxu3 %v161_v8  ;;  %793 = vmatpush.bf16.msra.mxu2 %v1205_v9 }
  0x45   :  { %820 = vmatpush.bf16.msra.mxu3 %v1205_v9 }
  0x46   :  { %733 = vmatpush.bf16.msra.mxu0 %v1204_v10 }
  0x47   :  { %767 = vmatpush.bf16.msra.mxu1 %v1204_v10 }
  0x48   :  { %794 = vmatpush.bf16.msra.mxu2 %v1204_v10 }
  0x49   :  { %821 = vmatpush.bf16.msra.mxu3 %v1204_v10 }
  0x4a   :  { %734 = vmatpush.bf16.msra.mxu0 %v1203_v11 }
  0x4b   :  { %768 = vmatpush.bf16.msra.mxu1 %v1203_v11 }
  0x4c   :  { %795 = vmatpush.bf16.msra.mxu2 %v1203_v11 }
  0x4d   :  { %822 = vmatpush.bf16.msra.mxu3 %v1203_v11 }
  0x4e   :  { %735 = vmatpush.bf16.msra.mxu0 %v1202_v12 }
  0x4f   :  { %769 = vmatpush.bf16.msra.mxu1 %v1202_v12 }
  0x50   :  { %796 = vmatpush.bf16.msra.mxu2 %v1202_v12 }
  0x51   :  { %823 = vmatpush.bf16.msra.mxu3 %v1202_v12 }
  0x52   :  { %736 = vmatpush.bf16.msra.mxu0 %v1201_v13 }
  0x53   :  { %770 = vmatpush.bf16.msra.mxu1 %v1201_v13 }
  0x54   :  { %797 = vmatpush.bf16.msra.mxu2 %v1201_v13 }
  0x55   :  { %824 = vmatpush.bf16.msra.mxu3 %v1201_v13 }
  0x56   :  { %737 = vmatpush.bf16.msra.mxu0 %v1200_v16 }
  0x57   :  { %771 = vmatpush.bf16.msra.mxu1 %v1200_v16 }
  0x58   :  { %798 = vmatpush.bf16.msra.mxu2 %v1200_v16 }
  0x59   :  { %825 = vmatpush.bf16.msra.mxu3 %v1200_v16 }
  0x5a   :  { %738 = vmatpush.bf16.msra.mxu0 %v1199_v18 }
  0x5b   :  { %772 = vmatpush.bf16.msra.mxu1 %v1199_v18 }
  0x5c   :  { %799 = vmatpush.bf16.msra.mxu2 %v1199_v18 }
  0x5d   :  { %826 = vmatpush.bf16.msra.mxu3 %v1199_v18  ;;  %v755_v18 = vlaneseq }
  0x5e   :  { %739 = vmatpush.bf16.msra.mxu0 %v1198_v22 }
  0x5f   :  { %773 = vmatpush.bf16.msra.mxu1 %v1198_v22 }
  0x60   :  { %800 = vmatpush.bf16.msra.mxu2 %v1198_v22 }
  0x61   :  { %827 = vmatpush.bf16.msra.mxu3 %v1198_v22 }
  0x9e   :  { %v563_v14 = vpop.f32.mrf.mxu0 }
  0x9f   :  { %v576_v15 = vpop.f32.mrf.mxu1 }
  0xa0   :  { %v577_v25 = vadd.f32 %v576_v15, %v563_v14 }
  0xa6   :  { %v589_v17 = vpop.f32.mrf.mxu2  ;;  %v565_v20 = vpop.f32.mrf.mxu0 }
  0xa7   :  { %v602_v19 = vpop.f32.mrf.mxu3  ;;  %v578_v21 = vpop.f32.mrf.mxu1  ;;  %v590_v26 = vadd.f32 %v589_v17, %v577_v25 }
  0xa9   :  { %v603_v27 = vadd.f32 %v602_v19, %v590_v26  ;;  %v756_v19 = vand.u32 127, %v755_v18 }
  0xae   :  { %v591_v23 = vpop.f32.mrf.mxu2 }
  0xaf   :  { %v604_v24 = vpop.f32.mrf.mxu3 }
  0xbe   :  { %v615_v28 = vpop.f32.mrf.mxu0 }
  0xbf   :  { %v628_v29 = vpop.f32.mrf.mxu1  ;;  %v616_v30 = vadd.f32 %v615_v28, %v603_v27 }
  0xc1   :  { %v629_v31 = vadd.f32 %v628_v29, %v616_v30 }
  0xc6   :  { %v641_v32 = vpop.f32.mrf.mxu2  ;;  %v617_v36 = vpop.f32.mrf.mxu0 }
  0xc7   :  { %v654_v33 = vpop.f32.mrf.mxu3  ;;  %v642_v35 = vadd.f32 %v641_v32, %v629_v31  ;;  %v630_v37 = vpop.f32.mrf.mxu1 }
  0xc9   :  { %v655_v41 = vadd.f32 %v654_v33, %v642_v35 }
  0xcb   :  { %v678_v42 = vadd.f32 %v1206_v34, %v655_v41  ;;  %v763_v43 = vadd.f32 %v1207_v38, %v655_v41  ;;  %v790_v44 = vadd.f32 %v1208_v39, %v655_v41  ;;  %v817_v45 = vadd.f32 %v1209_v40, %v655_v41 }
  0xcd   :  { %v679_v46 = vmax.f32 %v678_v42, 0.0  ;;  %v764_v47 = vmax.f32 %v763_v43, 0.0  ;;  %v791_v48 = vmax.f32 %v790_v44, 0.0  ;;  %v818_v49 = vmax.f32 %v817_v45, 0.0 }
  0xce   :  { %v643_v50 = vpop.f32.mrf.mxu2 }
  0xcf   :  { %v656_v51 = vpop.f32.mrf.mxu3  ;;  %v680_v52 = vpack.c.bf16 %v679_v46, %v679_v46  ;;  %v765_v53 = vpack.c.bf16 %v764_v47, %v764_v47  ;;  %v792_v54 = vpack.c.bf16 %v791_v48, %v791_v48  ;;  %v819_v55 = vpack.c.bf16 %v818_v49, %v818_v49 }
  0xd1   :  { %740 = vmatmul.bf16.vlgmr.msra.gmra.mxu0 %v680_v52  ;;  %774 = vmatmul.bf16.vlgmr.msra.gmra.mxu1 %v765_v53 }
  0xd2   :  { %801 = vmatmul.bf16.vlgmr.msra.gmra.mxu2 %v792_v54  ;;  %828 = vmatmul.bf16.vlgmr.msra.gmra.mxu3 %v819_v55 }
 0x14e   :  { %v741_v57 = vpop.f32.mrf.mxu0  ;;  %v775_v58 = vpop.f32.mrf.mxu1 }
 0x14f   :  { %v742_v59 = vadd.f32 %v1210_v56, %v741_v57  ;;  %v776_v62 = vadd.f32 %v1210_v56, %v775_v58 }
 0x151   :  { %v745_v61 = vmax.f32 %v742_v59, 0.0  ;;  %v779_v0 = vmax.f32 %v776_v62, 0.0 }
 0x153   :  { %v749_v63 = vmul.f32 %v1211_v60, %v745_v61  ;;  %v780_v9 = vmul.f32 %v1211_v60, %v779_v0 }
 0x155   :  { %v802_v1 = vpop.f32.mrf.mxu2  ;;  %v829_v2 = vpop.f32.mrf.mxu3  ;;  %v751_v3 = vsel %vm750_vm0, %v749_v63, 0.0  ;;  %v781_v15 = vsel %vm750_vm0, %v780_v9, 0.0 }
 0x156   :  { %v803_v4 = vadd.f32 %v1210_v56, %v802_v1  ;;  %v743_v5 = vpop.f32.mrf.mxu0  ;;  %v777_v6 = vpop.f32.mrf.mxu1  ;;  %752 = vadd.xlane.f32.xlu0 %v751_v3  ;;  %v830_v8 = vadd.f32 %v1210_v56, %v829_v2 }
 0x158   :  { %v806_v7 = vmax.f32 %v803_v4, 0.0  ;;  %v833_v11 = vmax.f32 %v830_v8, 0.0 }
 0x15a   :  { %v807_v10 = vmul.f32 %v1211_v60, %v806_v7  ;;  %v834_v16 = vmul.f32 %v1211_v60, %v833_v11 }
 0x15c   :  { %v808_v12 = vsel %vm750_vm0, %v807_v10, 0.0  ;;  %v835_v17 = vsel %vm750_vm0, %v834_v16, 0.0 }
 0x15d   :  { %v804_v13 = vpop.f32.mrf.mxu2  ;;  %v831_v14 = vpop.f32.mrf.mxu3  ;;  %809 = vadd.xlane.f32.xlu1 %v808_v12 }
 0x15e   :  { %782 = vadd.xlane.f32.xlu0 %v781_v15 }
 0x165   :  { %836 = vadd.xlane.f32.xlu1 %v835_v17 }
 0x1c9   :  { %v753_v20 = vpop.xlane.xlu0 %752 }
 0x1ca   :  { %v757_v21 = vperm.slane %v753_v20, %v756_v19 }
 0x1cc   :  { %760 = vst.msk [vmem:[%s1506_s6] sm:$0x1] %vm759_vm1, %v757_v21 }
 0x1d0   :  { %v810_v22 = vpop.xlane.xlu1 %809 }
 0x1d1   :  { %v812_v23 = vperm.slane %v810_v22, %v756_v19  ;;  %v783_v24 = vpop.xlane.xlu0 %782 }
 0x1d2   :  { %v785_v25 = vperm.slane %v783_v24, %v756_v19 }
 0x1d3   :  { %814 = vst.msk [vmem:[%s1506_s6 + $0x2] sm:$0x1] %vm759_vm1, %v812_v23 }
 0x1d4   :  { %787 = vst.msk [vmem:[%s1506_s6 + $0x1] sm:$0x1] %vm759_vm1, %v785_v25 }
 0x1d8   :  { %v837_v26 = vpop.xlane.xlu1 %836 }
 0x1d9   :  { %v839_v27 = vperm.slane %v837_v26, %v756_v19 }
 0x1db   :  { %841 = vst.msk [vmem:[%s1506_s6 + $0x3] sm:$0x1] %vm759_vm1, %v839_v27 }

</bundles_post_ra>
